<compile_context>
chip_gen: v6e
topology: v6e:2x2x1
jax: 0.10.0
libtpu: 0.0.40
codegen_flags: <defaults>
</compile_context>

<pallas_src>
import functools

import jax
import jax.numpy as jnp
from jax.experimental import pallas as pl
from jax.experimental.pallas import tpu as pltpu


def mv_aggregate_kernel(x_ref, wexp_ref, bb_ref, gamma_ref, beta_ref,
                        wfc_ref, bfc_ref, preds_ref, pooled_ref, acc_ref, *, eps):
    m = pl.program_id(1)

    # One view's pixels for TB batch rows.  Cast f32 -> bf16 in-kernel (cheap
    # VPU work, saves a full wrapper-side HBM pass) and run the fused
    # GAP + backbone-Linear as one (TB, C*HW) x (C*HW, F) bf16 MXU matmul with
    # f32 accumulation (the 1/HW of the spatial mean is folded into wexp).
    feats = jnp.dot(x_ref[...].astype(jnp.bfloat16), wexp_ref[...],
                    preferred_element_type=jnp.float32)            # (TB, F)

    # ViewMaxAgregate as a running elementwise max over the view grid axis:
    # aligned (TB, 128) tile, pure VPU, no sublane regrouping / unroll.
    @pl.when(m == 0)
    def _():
        acc_ref[...] = feats

    @pl.when(m != 0)
    def _():
        acc_ref[...] = jnp.maximum(acc_ref[...], feats)

    # Epilogue once per batch block.  Backbone bias is constant per feature,
    # so adding it after the max over views is exact.  Padded batch rows give
    # var == 0; rsqrt(0 + eps) stays finite (don't set eps = 0) and the rows
    # are sliced off by the wrapper.
    @pl.when(m == pl.num_programs(1) - 1)
    def _():
        pooled = acc_ref[...] + bb_ref[...]
        pooled_ref[...] = pooled
        mu = jnp.mean(pooled, axis=-1, keepdims=True)
        var = jnp.mean((pooled - mu) ** 2, axis=-1, keepdims=True)  # biased, as torch
        normed = (pooled - mu) * jax.lax.rsqrt(var + eps)
        normed = normed * gamma_ref[...] + beta_ref[...]
        # fc head: bf16 operands, f32 accumulation (fast MXU path; 128-deep
        # contraction keeps accuracy well within tolerance).
        preds = jnp.dot(normed.astype(jnp.bfloat16), wfc_ref[...],
                        preferred_element_type=jnp.float32)         # (TB, N)
        preds_ref[...] = preds + bfc_ref[...]


def mv_aggregate(mvimages, params, *, M=10, eps=1e-5, tb=512):
    BM, C, H, W = mvimages.shape
    assert BM % M == 0, "leading dim must be B*M"
    B = BM // M
    HW = H * W
    CHW = C * HW
    F = params["wb"].shape[1]
    N = params["wfc"].shape[1]

    # Metadata-only reshape (same row-major linear order): rows = batch, lanes =
    # view-major features.  No dtype cast here — the kernel casts per tile, so
    # the image tensor is read from HBM exactly once (kernel is HBM-bound on x).
    x2d = mvimages.reshape(B, M * CHW)

    # Batch block size: big enough to amortize per-step pipeline overhead and
    # fill the MXU row dimension, multiple of 16 (bf16 sublanes), but capped so
    # the "parallel" batch axis keeps >= 2 grid steps (v7x has 2 TensorCores).
    tb = max(8, min(tb, B))
    if B >= 16 and B // tb < 2:
        tb = max(8, (B // 2) // 8 * 8)
    if tb >= 16:
        tb -= tb % 16
    Bp = -(-B // tb) * tb
    if Bp != B:
        x2d = jnp.concatenate(
            [x2d, jnp.zeros((Bp - B, M * CHW), x2d.dtype)], axis=0)

    # Fuse GAP into the backbone matmul: wexp[c*HW + hw, f] = wb[c, f] / HW.
    # (For HW a power of two the /HW is exact, so bf16(wexp) == bf16(wb)/HW.)
    wexp = jnp.broadcast_to(params["wb"][:, None, :] / HW, (C, HW, F))
    wexp = wexp.reshape(CHW, F).astype(jnp.bfloat16)
    wfc_bf16 = params["wfc"].astype(jnp.bfloat16)

    kernel = functools.partial(mv_aggregate_kernel, eps=eps)
    preds, pooled = pl.pallas_call(
        kernel,
        out_shape=(jax.ShapeDtypeStruct((Bp, N), jnp.float32),
                   jax.ShapeDtypeStruct((Bp, F), jnp.float32)),
        grid_spec=pltpu.PrefetchScalarGridSpec(
            num_scalar_prefetch=0,
            grid=(Bp // tb, M),
            in_specs=[
                pl.BlockSpec((tb, CHW), lambda b, m: (b, m)),   # view m's pixels
                pl.BlockSpec((CHW, F), lambda b, m: (0, 0)),    # fused GAP+Linear W
                pl.BlockSpec((1, F), lambda b, m: (0, 0)),      # backbone bias
                pl.BlockSpec((1, F), lambda b, m: (0, 0)),      # LayerNorm gamma
                pl.BlockSpec((1, F), lambda b, m: (0, 0)),      # LayerNorm beta
                pl.BlockSpec((F, N), lambda b, m: (0, 0)),      # fc weight (bf16)
                pl.BlockSpec((1, N), lambda b, m: (0, 0)),      # fc bias
            ],
            out_specs=[
                pl.BlockSpec((tb, N), lambda b, m: (b, 0)),     # predictions
                pl.BlockSpec((tb, F), lambda b, m: (b, 0)),     # pooled_view
            ],
            scratch_shapes=[pltpu.VMEM((tb, F), jnp.float32)],  # running max
        ),
        compiler_params=pltpu.CompilerParams(
            dimension_semantics=("parallel", "arbitrary"),
            # working set ~6 MiB at tb=512; explicit limit keeps headroom on
            # v7x's 64 MiB physical VMEM.
            vmem_limit_bytes=32 * 1024 * 1024),
    )(x2d, wexp, params["bb"], params["gamma"], params["beta"],
      wfc_bf16, params["bfc"])

    # torch returns (predictions, pooled_view); .squeeze() is a no-op for B > 1.
    return preds[:B], pooled[:B]


if __name__ == "__main__":
    B, M, C, H, W = 32, 10, 4, 16, 16
    feat_dim, num_classes = 128, 128
    HW = H * W

    key = jax.random.PRNGKey(0)
    k1, k2, k3, k4 = jax.random.split(key, 4)
    mvimages = jax.random.normal(k1, (B * M, C, H, W), dtype=jnp.float32)

    params = {
        "wb":    jax.random.normal(k2, (C, feat_dim), jnp.float32) * 0.1,
        "bb":    jnp.zeros((1, feat_dim), jnp.float32),
        "gamma": jnp.ones((1, feat_dim), jnp.float32),
        "beta":  jnp.zeros((1, feat_dim), jnp.float32),
        "wfc":   jax.random.normal(k3, (feat_dim, num_classes), jnp.float32) * 0.05,
        "bfc":   jax.random.normal(k4, (1, num_classes), jnp.float32) * 0.01,
    }

    mv_fn = jax.jit(functools.partial(mv_aggregate, M=M))
    preds, pooled = mv_fn(mvimages, params)
    jax.block_until_ready((preds, pooled))

    # Plain-JAX reference of the same forward pass, mirroring the kernel's
    # quantization choices (images / backbone W / head operands in bf16,
    # accumulation in f32); remaining differences are f32 summation order.
    xq = mvimages.astype(jnp.bfloat16).astype(jnp.float32)
    wbq = params["wb"].astype(jnp.bfloat16).astype(jnp.float32)
    gap = xq.reshape(B, M, C, HW).mean(-1)                        # (B, M, C)
    with jax.default_matmul_precision("highest"):
        feats = gap @ wbq                                         # (B, M, F)
        pooled_want = feats.max(axis=1) + params["bb"]            # (B, F)
        mu = pooled_want.mean(-1, keepdims=True)
        var = ((pooled_want - mu) ** 2).mean(-1, keepdims=True)
        normed = (pooled_want - mu) * jax.lax.rsqrt(var + 1e-5)
        normed = normed * params["gamma"] + params["beta"]
        normed_q = normed.astype(jnp.bfloat16).astype(jnp.float32)
        wfcq = params["wfc"].astype(jnp.bfloat16).astype(jnp.float32)
        preds_want = normed_q @ wfcq + params["bfc"]

    assert preds.shape == (B, num_classes) and pooled.shape == (B, feat_dim)
    assert jnp.allclose(pooled, pooled_want, atol=1e-4, rtol=1e-3)
    assert jnp.allclose(preds, preds_want, atol=3e-3, rtol=3e-3)
    print("KERNEL_OK")
</pallas_src>

<mosaic_0001>
module attributes {stable_mosaic.version = 11 : i64} {
  func.func @mv_aggregate_kernel(%arg0: i32, %arg1: i32, %arg2: memref<16x1024xf32, #tpu.memory_space<vmem>>, %arg3: memref<1024x128xbf16, #tpu.memory_space<vmem>>, %arg4: memref<1x128xf32, #tpu.memory_space<vmem>>, %arg5: memref<1x128xf32, #tpu.memory_space<vmem>>, %arg6: memref<1x128xf32, #tpu.memory_space<vmem>>, %arg7: memref<128x128xbf16, #tpu.memory_space<vmem>>, %arg8: memref<1x128xf32, #tpu.memory_space<vmem>>, %arg9: memref<16x128xf32, #tpu.memory_space<vmem>>, %arg10: memref<16x128xf32, #tpu.memory_space<vmem>>, %arg11: memref<16x128xf32, #tpu.memory_space<vmem>>) attributes {dimension_semantics = [#tpu.dimension_semantics<parallel>, #tpu.dimension_semantics<arbitrary>], iteration_bounds = array<i64: 2, 10>, scalar_prefetch = 0 : i64, scratch_operands = 1 : i64, tpu.core_type = #tpu.core_type<tc>, window_params = [{transform_indices = @transform_0, window_bounds = array<i64: 16, 1024>}, {pipeline_mode = #tpu.pipeline_mode<synchronous>, transform_indices = @transform_1, window_bounds = array<i64: 1024, 128>}, {pipeline_mode = #tpu.pipeline_mode<synchronous>, transform_indices = @transform_2, window_bounds = array<i64: 1, 128>}, {pipeline_mode = #tpu.pipeline_mode<synchronous>, transform_indices = @transform_3, window_bounds = array<i64: 1, 128>}, {pipeline_mode = #tpu.pipeline_mode<synchronous>, transform_indices = @transform_4, window_bounds = array<i64: 1, 128>}, {pipeline_mode = #tpu.pipeline_mode<synchronous>, transform_indices = @transform_5, window_bounds = array<i64: 128, 128>}, {pipeline_mode = #tpu.pipeline_mode<synchronous>, transform_indices = @transform_6, window_bounds = array<i64: 1, 128>}, {transform_indices = @transform_7, window_bounds = array<i64: 16, 128>}, {transform_indices = @transform_8, window_bounds = array<i64: 16, 128>}]} {
    %c0 = arith.constant 0 : index
    %c0_0 = arith.constant 0 : index
    %0 = vector.load %arg2[%c0, %c0_0] : memref<16x1024xf32, #tpu.memory_space<vmem>>, vector<16x1024xf32>
    %1 = arith.truncf %0 : vector<16x1024xf32> to vector<16x1024xbf16>
    %c0_1 = arith.constant 0 : index
    %c0_2 = arith.constant 0 : index
    %2 = vector.load %arg3[%c0_1, %c0_2] : memref<1024x128xbf16, #tpu.memory_space<vmem>>, vector<1024x128xbf16>
    %cst = arith.constant dense<0.000000e+00> : vector<16x128xf32>
    %3 = tpu.matmul %1, %2, %cst {dimension_numbers = #tpu.dot_dimension_numbers<[1], [0], [0], [1], [0, 0, 1, 1], [], []>} : vector<16x1024xbf16>, vector<1024x128xbf16>, vector<16x128xf32> -> vector<16x128xf32>
    %c0_i32 = arith.constant 0 : i32
    %4 = arith.cmpi eq, %arg1, %c0_i32 : i32
    %5 = arith.extui %4 : i1 to i32
    %c0_i32_3 = arith.constant 0 : i32
    %6 = arith.cmpi ne, %5, %c0_i32_3 : i32
    scf.if %6 {
      %c0_7 = arith.constant 0 : index
      %c0_8 = arith.constant 0 : index
      %13 = vector.load %arg11[%c0_7, %c0_8] : memref<16x128xf32, #tpu.memory_space<vmem>>, vector<16x128xf32>
      tpu.vector_store %arg11[%c0_7, %c0_8], %3 {strides = array<i32>} : memref<16x128xf32, #tpu.memory_space<vmem>>, vector<16x128xf32>,
    } else {
    }
    %c0_i32_4 = arith.constant 0 : i32
    %7 = arith.cmpi ne, %arg1, %c0_i32_4 : i32
    %8 = arith.extui %7 : i1 to i32
    %c0_i32_5 = arith.constant 0 : i32
    %9 = arith.cmpi ne, %8, %c0_i32_5 : i32
    scf.if %9 {
      %c0_7 = arith.constant 0 : index
      %c0_8 = arith.constant 0 : index
      %13 = vector.load %arg11[%c0_7, %c0_8] : memref<16x128xf32, #tpu.memory_space<vmem>>, vector<16x128xf32>
      %14 = arith.maximumf %13, %3 : vector<16x128xf32>
      %c0_9 = arith.constant 0 : index
      %c0_10 = arith.constant 0 : index
      %15 = vector.load %arg11[%c0_9, %c0_10] : memref<16x128xf32, #tpu.memory_space<vmem>>, vector<16x128xf32>
      tpu.vector_store %arg11[%c0_9, %c0_10], %14 {strides = array<i32>} : memref<16x128xf32, #tpu.memory_space<vmem>>, vector<16x128xf32>,
    } else {
    }
    %c9_i32 = arith.constant 9 : i32
    %10 = arith.cmpi eq, %arg1, %c9_i32 : i32
    %11 = arith.extui %10 : i1 to i32
    %c0_i32_6 = arith.constant 0 : i32
    %12 = arith.cmpi ne, %11, %c0_i32_6 : i32
    scf.if %12 {
      %c0_7 = arith.constant 0 : index
      %c0_8 = arith.constant 0 : index
      %13 = vector.load %arg11[%c0_7, %c0_8] : memref<16x128xf32, #tpu.memory_space<vmem>>, vector<16x128xf32>
      %c0_9 = arith.constant 0 : index
      %c0_10 = arith.constant 0 : index
      %14 = vector.load %arg4[%c0_9, %c0_10] : memref<1x128xf32, #tpu.memory_space<vmem>>, vector<1x128xf32>
      %15 = vector.broadcast %14 : vector<1x128xf32> to vector<16x128xf32>
      %16 = arith.addf %13, %15 : vector<16x128xf32>
      %c0_11 = arith.constant 0 : index
      %c0_12 = arith.constant 0 : index
      %17 = vector.load %arg10[%c0_11, %c0_12] : memref<16x128xf32, #tpu.memory_space<vmem>>, vector<16x128xf32>
      tpu.vector_store %arg10[%c0_11, %c0_12], %16 {strides = array<i32>} : memref<16x128xf32, #tpu.memory_space<vmem>>, vector<16x128xf32>,
      %cst_13 = arith.constant dense<0.000000e+00> : vector<16xf32>
      %18 = vector.multi_reduction <add>, %16, %cst_13 [1] : vector<16x128xf32> to vector<16xf32>
      %19 = vector.shape_cast %18 : vector<16xf32> to vector<16x1xf32>
      %cst_14 = arith.constant 1.280000e+02 : f32
      %20 = vector.broadcast %cst_14 : f32 to vector<16x1xf32>
      %21 = arith.divf %19, %20 : vector<16x1xf32>
      %22 = vector.broadcast %21 : vector<16x1xf32> to vector<16x128xf32>
      %23 = arith.subf %16, %22 : vector<16x128xf32>
      %24 = arith.mulf %23, %23 : vector<16x128xf32>
      %cst_15 = arith.constant dense<0.000000e+00> : vector<16xf32>
      %25 = vector.multi_reduction <add>, %24, %cst_15 [1] : vector<16x128xf32> to vector<16xf32>
      %26 = vector.shape_cast %25 : vector<16xf32> to vector<16x1xf32>
      %cst_16 = arith.constant 1.280000e+02 : f32
      %27 = vector.broadcast %cst_16 : f32 to vector<16x1xf32>
      %28 = arith.divf %26, %27 : vector<16x1xf32>
      %29 = vector.broadcast %21 : vector<16x1xf32> to vector<16x128xf32>
      %30 = arith.subf %16, %29 : vector<16x128xf32>
      %cst_17 = arith.constant 9.99999974E-6 : f32
      %31 = vector.broadcast %cst_17 : f32 to vector<16x1xf32>
      %32 = arith.addf %28, %31 : vector<16x1xf32>
      %33 = math.rsqrt %32 : vector<16x1xf32>
      %34 = vector.broadcast %33 : vector<16x1xf32> to vector<16x128xf32>
      %35 = arith.mulf %30, %34 : vector<16x128xf32>
      %c0_18 = arith.constant 0 : index
      %c0_19 = arith.constant 0 : index
      %36 = vector.load %arg5[%c0_18, %c0_19] : memref<1x128xf32, #tpu.memory_space<vmem>>, vector<1x128xf32>
      %37 = vector.broadcast %36 : vector<1x128xf32> to vector<16x128xf32>
      %38 = arith.mulf %35, %37 : vector<16x128xf32>
      %c0_20 = arith.constant 0 : index
      %c0_21 = arith.constant 0 : index
      %39 = vector.load %arg6[%c0_20, %c0_21] : memref<1x128xf32, #tpu.memory_space<vmem>>, vector<1x128xf32>
      %40 = vector.broadcast %39 : vector<1x128xf32> to vector<16x128xf32>
      %41 = arith.addf %38, %40 : vector<16x128xf32>
      %42 = arith.truncf %41 : vector<16x128xf32> to vector<16x128xbf16>
      %c0_22 = arith.constant 0 : index
      %c0_23 = arith.constant 0 : index
      %43 = vector.load %arg7[%c0_22, %c0_23] : memref<128x128xbf16, #tpu.memory_space<vmem>>, vector<128x128xbf16>
      %cst_24 = arith.constant dense<0.000000e+00> : vector<16x128xf32>
      %44 = tpu.matmul %42, %43, %cst_24 {dimension_numbers = #tpu.dot_dimension_numbers<[1], [0], [0], [1], [0, 0, 1, 1], [], []>} : vector<16x128xbf16>, vector<128x128xbf16>, vector<16x128xf32> -> vector<16x128xf32>
      %c0_25 = arith.constant 0 : index
      %c0_26 = arith.constant 0 : index
      %45 = vector.load %arg8[%c0_25, %c0_26] : memref<1x128xf32, #tpu.memory_space<vmem>>, vector<1x128xf32>
      %46 = vector.broadcast %45 : vector<1x128xf32> to vector<16x128xf32>
      %47 = arith.addf %44, %46 : vector<16x128xf32>
      %c0_27 = arith.constant 0 : index
      %c0_28 = arith.constant 0 : index
      %48 = vector.load %arg9[%c0_27, %c0_28] : memref<16x128xf32, #tpu.memory_space<vmem>>, vector<16x128xf32>
      tpu.vector_store %arg9[%c0_27, %c0_28], %47 {strides = array<i32>} : memref<16x128xf32, #tpu.memory_space<vmem>>, vector<16x128xf32>,
    } else {
    }
    return
  }
  func.func @transform_0(%arg0: i32, %arg1: i32) -> (i32, i32) {
    %c0_i32 = arith.constant 0 : i32
    return %arg0, %arg1 : i32, i32
  }
  func.func @transform_1(%arg0: i32, %arg1: i32) -> (i32, i32) {
    %c0_i32 = arith.constant 0 : i32
    %c0_i32_0 = arith.constant 0 : i32
    %c0_i32_1 = arith.constant 0 : i32
    return %c0_i32, %c0_i32_0 : i32, i32
  }
  func.func @transform_2(%arg0: i32, %arg1: i32) -> (i32, i32) {
    %c0_i32 = arith.constant 0 : i32
    %c0_i32_0 = arith.constant 0 : i32
    %c0_i32_1 = arith.constant 0 : i32
    return %c0_i32, %c0_i32_0 : i32, i32
  }
  func.func @transform_3(%arg0: i32, %arg1: i32) -> (i32, i32) {
    %c0_i32 = arith.constant 0 : i32
    %c0_i32_0 = arith.constant 0 : i32
    %c0_i32_1 = arith.constant 0 : i32
    return %c0_i32, %c0_i32_0 : i32, i32
  }
  func.func @transform_4(%arg0: i32, %arg1: i32) -> (i32, i32) {
    %c0_i32 = arith.constant 0 : i32
    %c0_i32_0 = arith.constant 0 : i32
    %c0_i32_1 = arith.constant 0 : i32
    return %c0_i32, %c0_i32_0 : i32, i32
  }
  func.func @transform_5(%arg0: i32, %arg1: i32) -> (i32, i32) {
    %c0_i32 = arith.constant 0 : i32
    %c0_i32_0 = arith.constant 0 : i32
    %c0_i32_1 = arith.constant 0 : i32
    return %c0_i32, %c0_i32_0 : i32, i32
  }
  func.func @transform_6(%arg0: i32, %arg1: i32) -> (i32, i32) {
    %c0_i32 = arith.constant 0 : i32
    %c0_i32_0 = arith.constant 0 : i32
    %c0_i32_1 = arith.constant 0 : i32
    return %c0_i32, %c0_i32_0 : i32, i32
  }
  func.func @transform_7(%arg0: i32, %arg1: i32) -> (i32, i32) {
    %c0_i32 = arith.constant 0 : i32
    %c0_i32_0 = arith.constant 0 : i32
    return %arg0, %c0_i32 : i32, i32
  }
  func.func @transform_8(%arg0: i32, %arg1: i32) -> (i32, i32) {
    %c0_i32 = arith.constant 0 : i32
    %c0_i32_0 = arith.constant 0 : i32
    return %arg0, %c0_i32 : i32, i32
  }
}

</mosaic_0001>

<bundles_post_ra>
// kernel: mv_aggregate.1
= control target key start
LH: loop header
LB: loop body
LE: loop exit
PB: predicated region body
PF: predicated region fallthrough
CT: control target
= control target key end

     0   :  { %s2498_s0 = inlined_call_operand.vmem [shape: f32[32,10240], index: 0, kind: input, shape index: {}]   ;;  %s2499_s1 = inlined_call_operand.vmem [shape: bf16[1024,128], index: 1, kind: input, shape index: {}]   ;;  %s2500_s2 = inlined_call_operand.vmem [shape: f32[1,128], index: 2, kind: input, shape index: {}]   ;;  %s2501_s3 = inlined_call_operand.vmem [shape: f32[1,128], index: 3, kind: input, shape index: {}]   ;;  %s2502_s4 = inlined_call_operand.vmem [shape: f32[1,128], index: 4, kind: input, shape index: {}]   ;;  %s2503_s5 = inlined_call_operand.vmem [shape: bf16[128,128], index: 5, kind: input, shape index: {}]   ;;  %s2504_s6 = inlined_call_operand.vmem [shape: f32[1,128], index: 6, kind: input, shape index: {}]   ;;  %s2505_s7 = inlined_call_operand.hbm [shape: f32[32,128], index: 7, kind: output, shape index: {0}]   ;;  %s2506_s8 = inlined_call_operand.hbm [shape: f32[32,128], index: 8, kind: output, shape index: {1}]  }
   0x1   :  { %2512 = sst [smem:[#allocation14_spill]] %s2498_s0 }
   0x2   :  { %2513 = sst [smem:[#allocation15_spill]] %s2499_s1 }
   0x3   :  { %2514 = sst [smem:[#allocation16_spill]] %s2500_s2 }
   0x4   :  { %14 = vsyncpa [#allocation5], 0 }
   0x5   :  { %16 = vsyncpa [#allocation5 + $0x1], 0 }
   0x6   :  { %17 = vsyncpa [#allocation7], 0 }
   0x7   :  { %19 = vsyncpa [#allocation7 + $0x1], 0  ;;  %s2008_s27 = smov 0   ;;  %s2010_s28 = smov 0  }
   0x8   :  { %s2012_s29 = smov 0   ;;  %s2014_s30 = smov 0  }
   0x9   :  { %s2016_s9 = smov 0   ;;  %s2018_s10 = smov 0  }
   0xa   :  { %s2020_s11 = smov 0   ;;  %s2022_s12 = smov 0  }
   0xb   :  { %s2024_s13 = smov 0   ;;  %s2026_s14 = smov 0  }
   0xc LB: > { %2515 = sst [smem:[#allocation10_spill]] %s1919_s27  ;;  %s1425_s15 = sadd.s32 4294967295, %s1955_s14   ;;  %s1955_s14 = sphi %s2026_s14, %s25_s14   ;;  %s1951_s13 = sphi %s2024_s13, %s2541_s13   ;;  %s1947_s12 = sphi %s2022_s12, %s2540_s12   ;;  %s1943_s11 = sphi %s2020_s11, %s2539_s11   ;;  %s1939_s10 = sphi %s2018_s10, %s2538_s10   ;;  %s1935_s9 = sphi %s2016_s9, %s2537_s9   ;;  %s1931_s30 = sphi %s2014_s30, %s2536_s30   ;;  %s1927_s29 = sphi %s2012_s29, %s2535_s29   ;;  %s1923_s28 = sphi %s2010_s28, %s2534_s28   ;;  %s1919_s27 = sphi %s2008_s27, %s2533_s27  }
   0xd   : > { %s1426_s16 = sadd.s32 4294967294, %s1955_s14   ;;  %s34_s17 = sadd.s32 1, %s1947_s12 }
   0xe   : > { %s37_s18 = sadd.s32 1, %s1951_s13  ;;  %p35_p0 = scmp.ge.s32.totalorder %s34_s17, 10 }
   0xf   : > { %s46_s19 = sadd.s32 1, %s1935_s9  ;;  %p53_p1 = scmp.ne.s32.totalorder %s1935_s9, %s1931_s30 }
  0x10   : > { %p54_p2 = scmp.eq.s32.totalorder %s1955_s14, 0  ;;  %s2543_s17 = smov (%p35_p0, %s34_s17), 0 }
  0x11   : > { %2516 = sst [smem:[#allocation11_spill]] %s2543_s17  ;;  %s2545_s18 = smov (!%p35_p0, %s37_s18), %s1951_s13 }
  0x12   : > { %s42_s20 = ssub.s32 %s1947_s12, %s2543_s17  ;;  %p2071_p3 = por %p54_p2, %p53_p1 }
  0x13   : > { %p39_p4 = scmp.ge.s32.totalorder %s2545_s18, 2  ;;  %s198_s22 = sadd.s32 1, %s1927_s29 }
  0x14   : > { %p208_p5 = scmp.ne.s32.totalorder %s1927_s29, %s1923_s28  ;;  %p209_p6 = scmp.eq.s32.totalorder %s1425_s15, 19 }
  0x15   : > { %s2547_s18 = smov (%p39_p4, %s2545_s18), 0  ;;  %p214_p8 = scmp.ne.s32.totalorder %s1923_s28, %s1919_s27 }
  0x16   : > { %2518 = sst [smem:[#allocation12_spill]] %s2547_s18  ;;  %p2080_p7 = por %p209_p6, %p208_p5 }
  0x17   : > { %s41_s24 = ssub.s32 %s1951_s13, %s2547_s18  ;;  %p215_p9 = scmp.eq.s32.totalorder %s1426_s16, 19 }
  0x18   : > { %s43_s25 = sor.u32 %s42_s20, %s41_s24  ;;  %p196_p10 = scmp.eq.s32.totalorder %s41_s24, 0 }
  0x19   : > { %p44_p11 = scmp.eq.s32.totalorder %s43_s25, 0  ;;  %p2088_p12 = por %p215_p9, %p214_p8 }
  0x1a   : > { %s2093_s17 = scalar_select %p196_p10, %s1927_s29, %s198_s22  }
  0x1b   : > { %s2520_s26 = scalar_select %p2088_p12, 1, 0 }
  0x1c   : > { %s2096_s15 = scalar_select %p44_p11, %s1935_s9, %s46_s19  }
  0x1d   : > { %2521 = sst [smem:[#allocation13_spill]] %s2520_s26  ;;  %p1428_p13 = scmp.ge.s32.totalorder %s1955_s14, 20 }
  0x1f   : > { %275 = sbr.rel (%p1428_p13) target bundleno = 54 (0x36), region = 40 }
  0x24   : > { %278 = sbr.rel (!%p2071_p3) target bundleno = 54 (0x36), region = 44  ;;  %s280_s16 = sand.u32 (%p2071_p3), 1, %s1935_s9  }
  0x25   : > { %s1431_s20 = sshll.u32 (%p2071_p3), %s1947_s12, 3  ;;  %s1429_s24 = sshll.u32 (%p2071_p3), %s280_s16, 7 }
  0x26   : > { %s1644_s25 = smul.u32 (%p2071_p3), 160, %s1951_s13  ;;  %s2522_s0 = sld [smem:[#allocation14_spill]] (%p2071_p3) }
  0x27   : > { %s282_s21 = scalar_lea.vmem (%p2071_p3), [#allocation3], %s1429_s24 }
  0x28   : > { %s286_s18 = sadd.s32 (%p2071_p3), %s1644_s25, %s1431_s20 }
  0x29   : > { %s1433_s27 = sshll.u32 %s286_s18, 3 }
  0x2c   : > { %s2107_s19 = scalar_lea.vmem %s2522_s0, %s1433_s27 }
  0x2d   : > { %v301_v0 = vld [vmem:[%s2107_s19] sm:$0xff]  ;;  %v303_v1 = vld [vmem:[%s2107_s19 + $0x8] sm:$0xff]  ;;  %v305_v2 = vld [vmem:[%s2107_s19 + $0x10] sm:$0xff] }
  0x2e   : > { %302 = vst [vmem:[%s282_s21] sm:$0xff] %v301_v0  ;;  %304 = vst [vmem:[%s282_s21 + $0x8] sm:$0xff] %v303_v1  ;;  %v307_v3 = vld [vmem:[%s2107_s19 + $0x18] sm:$0xff]  ;;  %v309_v4 = vld [vmem:[%s2107_s19 + $0x20] sm:$0xff] }
  0x2f   : > { %306 = vst [vmem:[%s282_s21 + $0x10] sm:$0xff] %v305_v2  ;;  %v311_v5 = vld [vmem:[%s2107_s19 + $0x28] sm:$0xff]  ;;  %308 = vst [vmem:[%s282_s21 + $0x18] sm:$0xff] %v307_v3  ;;  %v313_v6 = vld [vmem:[%s2107_s19 + $0x30] sm:$0xff] }
  0x30   : > { %310 = vst [vmem:[%s282_s21 + $0x20] sm:$0xff] %v309_v4  ;;  %312 = vst [vmem:[%s282_s21 + $0x28] sm:$0xff] %v311_v5  ;;  %v315_v7 = vld [vmem:[%s2107_s19 + $0x38] sm:$0xff]  ;;  %v317_v8 = vld [vmem:[%s2107_s19 + $0x280] sm:$0xff] }
  0x31   : > { %314 = vst [vmem:[%s282_s21 + $0x30] sm:$0xff] %v313_v6  ;;  %316 = vst [vmem:[%s282_s21 + $0x38] sm:$0xff] %v315_v7  ;;  %v319_v9 = vld [vmem:[%s2107_s19 + $0x288] sm:$0xff]  ;;  %v321_v10 = vld [vmem:[%s2107_s19 + $0x290] sm:$0xff] }
  0x32   : > { %318 = vst [vmem:[%s282_s21 + $0x40] sm:$0xff] %v317_v8  ;;  %v323_v11 = vld [vmem:[%s2107_s19 + $0x298] sm:$0xff]  ;;  %320 = vst [vmem:[%s282_s21 + $0x48] sm:$0xff] %v319_v9  ;;  %v325_v12 = vld [vmem:[%s2107_s19 + $0x2a0] sm:$0xff] }
  0x33   : > { %322 = vst [vmem:[%s282_s21 + $0x50] sm:$0xff] %v321_v10  ;;  %324 = vst [vmem:[%s282_s21 + $0x58] sm:$0xff] %v323_v11  ;;  %v327_v13 = vld [vmem:[%s2107_s19 + $0x2a8] sm:$0xff]  ;;  %v329_v14 = vld [vmem:[%s2107_s19 + $0x2b0] sm:$0xff] }
  0x34   : > { %326 = vst [vmem:[%s282_s21 + $0x60] sm:$0xff] %v325_v12  ;;  %328 = vst [vmem:[%s282_s21 + $0x68] sm:$0xff] %v327_v13  ;;  %v331_v15 = vld [vmem:[%s2107_s19 + $0x2b8] sm:$0xff] }
  0x35   : > { %330 = vst [vmem:[%s282_s21 + $0x70] sm:$0xff] %v329_v14  ;;  %332 = vst [vmem:[%s282_s21 + $0x78] sm:$0xff] %v331_v15 }
  0x36 PF: > { %p1434_p0 = scmp.ge.s32.totalorder %s1955_s14, 1  ;;  %p337_p1 = scmp.lt.s32.totalorder %s1955_s14, 21 }
  0x38   : > { %p338_p2 = pnand %p1434_p0, %p337_p1 }
  0x39   : > { %s2128_s27 = sand.u32 (!%p338_p2), 1, %s1923_s28   ;;  %s2523_s1 = sld [smem:[#allocation15_spill]] (!%p338_p2) }
  0x3a   : > { %341 = sbr.rel (%p338_p2) target bundleno = 917 (0x395), region = 67  ;;  %s344_s19 = sand.u32 (!%p338_p2), 1, %s1931_s30  }
  0x3b   : > { %s1435_s24 = sshll.u32 (!%p338_p2), %s344_s19, 7  ;;  %p1502_p3 = scmp.ne.s32.totalorder (!%p338_p2), %s1939_s10, 0 }
  0x3c   : > { %s2228_s30 = scalar_lea.vmem (!%p338_p2), [#allocation3], %s1435_s24 }
  0x3f   : > { %v1741_v16 = vld [vmem:[%s2523_s1 + $0x78] sm:$0xff]   ;;  %v1745_v20 = vld [vmem:[%s2523_s1 + $0x70] sm:$0xff]   ;;  %v1749_v24 = vld [vmem:[%s2523_s1 + $0x68] sm:$0xff]  }
  0x40   : > { %v1742_v17 = vld [vmem:[%s2523_s1 + $0xf8] sm:$0xff]   ;;  %1527 = vmatprep.subr.bf16.mxu0 %v1741_v16  ;;  %v1746_v21 = vld [vmem:[%s2523_s1 + $0xf0] sm:$0xff]   ;;  %v1750_v25 = vld [vmem:[%s2523_s1 + $0xe8] sm:$0xff]  }
  0x41   : > { %1549 = vmatprep.subr.bf16.mxu1 %v1742_v17  ;;  %v1743_v18 = vld [vmem:[%s2523_s1 + $0x38] sm:$0xff]   ;;  %v1747_v22 = vld [vmem:[%s2523_s1 + $0x30] sm:$0xff]   ;;  %v1751_v26 = vld [vmem:[%s2523_s1 + $0x28] sm:$0xff]  }
  0x42   : > { %v1744_v19 = vld [vmem:[%s2523_s1 + $0xb8] sm:$0xff]   ;;  %1528 = vmatpush3.bf16.msra.mxu0 %v1743_v18  ;;  %v1748_v23 = vld [vmem:[%s2523_s1 + $0xb0] sm:$0xff]   ;;  %v1752_v27 = vld [vmem:[%s2523_s1 + $0xa8] sm:$0xff]  }
  0x43   : > { %1550 = vmatpush3.bf16.msra.mxu1 %v1744_v19  ;;  %1529 = vmatprep.subr.bf16.mxu0 %v1745_v20  ;;  %v1753_v28 = vld [vmem:[%s2523_s1 + $0x60] sm:$0xff]   ;;  %v1757_v32 = vld [vmem:[%s2523_s1 + $0x58] sm:$0xff]   ;;  %v1761_v36 = vld [vmem:[%s2523_s1 + $0x50] sm:$0xff]  }
  0x44   : > { %1551 = vmatprep.subr.bf16.mxu1 %v1746_v21  ;;  %v1754_v29 = vld [vmem:[%s2523_s1 + $0xe0] sm:$0xff]   ;;  %v1758_v33 = vld [vmem:[%s2523_s1 + $0xd8] sm:$0xff]   ;;  %v1762_v37 = vld [vmem:[%s2523_s1 + $0xd0] sm:$0xff]  }
  0x45   : > { %v1755_v30 = vld [vmem:[%s2523_s1 + $0x20] sm:$0xff]   ;;  %v1759_v34 = vld [vmem:[%s2523_s1 + $0x18] sm:$0xff]   ;;  %v1763_v38 = vld [vmem:[%s2523_s1 + $0x10] sm:$0xff]  }
  0x46   : > { %1530 = vmatpush3.bf16.msra.mxu0 %v1747_v22  ;;  %v1756_v31 = vld [vmem:[%s2523_s1 + $0xa0] sm:$0xff]   ;;  %v1760_v35 = vld [vmem:[%s2523_s1 + $0x98] sm:$0xff]   ;;  %v1764_v39 = vld [vmem:[%s2523_s1 + $0x90] sm:$0xff]  }
  0x47   : > { %1552 = vmatpush3.bf16.msra.mxu1 %v1748_v23  ;;  %1531 = vmatprep.subr.bf16.mxu0 %v1749_v24  ;;  %v1765_v40 = vld [vmem:[%s2523_s1 + $0x48] sm:$0xff]   ;;  %v1769_v44 = vld [vmem:[%s2523_s1 + $0x40] sm:$0xff]   ;;  %v388_v48 = vld [vmem:[%s2228_s30 + $0x8] sm:$0xff] }
  0x48   : > { %1553 = vmatprep.subr.bf16.mxu1 %v1750_v25  ;;  %v1766_v41 = vld [vmem:[%s2523_s1 + $0xc8] sm:$0xff]   ;;  %v1770_v45 = vld [vmem:[%s2523_s1 + $0xc0] sm:$0xff]   ;;  %v396_v49 = vld [vmem:[%s2228_s30 + $0x48] sm:$0xff] }
  0x49   : > { %v1767_v42 = vld [vmem:[%s2523_s1 + $0x8] sm:$0xff]   ;;  %v1771_v46 = vld [vmem:[%s2523_s1] sm:$0xff]   ;;  %v404_v50 = vpack.c.bf16 %v396_v49, %v388_v48  ;;  %v387_v53 = vld [vmem:[%s2228_s30] sm:$0xff] }
  0x4a   : > { %1532 = vmatpush3.bf16.msra.mxu0 %v1751_v26  ;;  %v1768_v43 = vld [vmem:[%s2523_s1 + $0x88] sm:$0xff]   ;;  %v1772_v47 = vld [vmem:[%s2523_s1 + $0x80] sm:$0xff]   ;;  %v395_v55 = vld [vmem:[%s2228_s30 + $0x40] sm:$0xff] }
  0x4b   : > { %1554 = vmatpush3.bf16.msra.mxu1 %v1752_v27  ;;  %1533 = vmatprep.subr.bf16.mxu0 %v1753_v28  ;;  %v390_v51 = vld [vmem:[%s2228_s30 + $0x18] sm:$0xff]  ;;  %v389_v56 = vld [vmem:[%s2228_s30 + $0x10] sm:$0xff]  ;;  %v403_v58 = vpack.c.bf16 %v395_v55, %v387_v53  ;;  %v1773_v60 = vld [vmem:[%s2523_s1 + $0x178] sm:$0xff]  }
  0x4c   : > { %1555 = vmatprep.subr.bf16.mxu1 %v1754_v29  ;;  %v398_v52 = vld [vmem:[%s2228_s30 + $0x58] sm:$0xff]  ;;  %v397_v57 = vld [vmem:[%s2228_s30 + $0x50] sm:$0xff]  ;;  %955 = vmatprep.mubr.bf16.mxu0 %v404_v50  ;;  %v1774_v61 = vld [vmem:[%s2523_s1 + $0x1f8] sm:$0xff]  }
  0x4d   : > { %v406_v54 = vpack.c.bf16 %v398_v52, %v390_v51  ;;  %v405_v59 = vpack.c.bf16 %v397_v57, %v389_v56  ;;  %v1775_v62 = vld [vmem:[%s2523_s1 + $0x138] sm:$0xff]   ;;  %v1777_v0 = vld [vmem:[%s2523_s1 + $0x170] sm:$0xff]   ;;  %v1781_v4 = vld [vmem:[%s2523_s1 + $0x168] sm:$0xff]  }
  0x4e   : > { %1534 = vmatpush3.bf16.msra.mxu0 %v1755_v30  ;;  %v1776_v63 = vld [vmem:[%s2523_s1 + $0x1b8] sm:$0xff]   ;;  %v1778_v1 = vld [vmem:[%s2523_s1 + $0x1f0] sm:$0xff]   ;;  %v1782_v5 = vld [vmem:[%s2523_s1 + $0x1e8] sm:$0xff]  }
  0x4f   : > { %1556 = vmatpush3.bf16.msra.mxu1 %v1756_v31  ;;  %1535 = vmatprep.subr.bf16.mxu0 %v1757_v32  ;;  %v1779_v2 = vld [vmem:[%s2523_s1 + $0x130] sm:$0xff]   ;;  %v1783_v6 = vld [vmem:[%s2523_s1 + $0x128] sm:$0xff]   ;;  %v1785_v8 = vld [vmem:[%s2523_s1 + $0x160] sm:$0xff]  }
  0x50   : > { %1557 = vmatprep.subr.bf16.mxu1 %v1758_v33  ;;  %996 = vmatprep.mubr.bf16.mxu1 %v406_v54  ;;  %v1780_v3 = vld [vmem:[%s2523_s1 + $0x1b0] sm:$0xff]   ;;  %v1784_v7 = vld [vmem:[%s2523_s1 + $0x1a8] sm:$0xff]   ;;  %v1786_v9 = vld [vmem:[%s2523_s1 + $0x1e0] sm:$0xff]  }
  0x51   : > { %v1787_v10 = vld [vmem:[%s2523_s1 + $0x120] sm:$0xff]   ;;  %v1789_v12 = vld [vmem:[%s2523_s1 + $0x158] sm:$0xff]   ;;  %v1793_v16 = vld [vmem:[%s2523_s1 + $0x150] sm:$0xff]  }
  0x52   : > { %1536 = vmatpush3.bf16.msra.mxu0 %v1759_v34  ;;  %v1788_v11 = vld [vmem:[%s2523_s1 + $0x1a0] sm:$0xff]   ;;  %v1790_v13 = vld [vmem:[%s2523_s1 + $0x1d8] sm:$0xff]   ;;  %v1794_v17 = vld [vmem:[%s2523_s1 + $0x1d0] sm:$0xff]  }
  0x53   : > { %1558 = vmatpush3.bf16.msra.mxu1 %v1760_v35  ;;  %1537 = vmatprep.subr.bf16.mxu0 %v1761_v36  ;;  %v1791_v14 = vld [vmem:[%s2523_s1 + $0x118] sm:$0xff]   ;;  %v1795_v18 = vld [vmem:[%s2523_s1 + $0x110] sm:$0xff]   ;;  %v1797_v20 = vld [vmem:[%s2523_s1 + $0x148] sm:$0xff]  }
  0x54   : > { %1559 = vmatprep.subr.bf16.mxu1 %v1762_v37  ;;  %v1792_v15 = vld [vmem:[%s2523_s1 + $0x198] sm:$0xff]   ;;  %v1796_v19 = vld [vmem:[%s2523_s1 + $0x190] sm:$0xff]   ;;  %v1798_v21 = vld [vmem:[%s2523_s1 + $0x1c8] sm:$0xff]  }
  0x55   : > { %v1799_v22 = vld [vmem:[%s2523_s1 + $0x108] sm:$0xff]   ;;  %v1801_v24 = vld [vmem:[%s2523_s1 + $0x140] sm:$0xff]   ;;  %v392_v28 = vld [vmem:[%s2228_s30 + $0x28] sm:$0xff] }
  0x56   : > { %1538 = vmatpush3.bf16.msra.mxu0 %v1763_v38  ;;  %v1800_v23 = vld [vmem:[%s2523_s1 + $0x188] sm:$0xff]   ;;  %v1802_v25 = vld [vmem:[%s2523_s1 + $0x1c0] sm:$0xff]   ;;  %v400_v29 = vld [vmem:[%s2228_s30 + $0x68] sm:$0xff] }
  0x57   : > { %1560 = vmatpush3.bf16.msra.mxu1 %v1764_v39  ;;  %1539 = vmatprep.subr.bf16.mxu0 %v1765_v40  ;;  %v1803_v26 = vld [vmem:[%s2523_s1 + $0x100] sm:$0xff]   ;;  %v394_v30 = vld [vmem:[%s2228_s30 + $0x38] sm:$0xff]  ;;  %v408_v31 = vpack.c.bf16 %v400_v29, %v392_v28  ;;  %v391_v33 = vld [vmem:[%s2228_s30 + $0x20] sm:$0xff] }
  0x58   : > { %1561 = vmatprep.subr.bf16.mxu1 %v1766_v41  ;;  %v1804_v27 = vld [vmem:[%s2523_s1 + $0x180] sm:$0xff]   ;;  %v402_v32 = vld [vmem:[%s2228_s30 + $0x78] sm:$0xff]  ;;  %v399_v34 = vld [vmem:[%s2228_s30 + $0x60] sm:$0xff] }
  0x59   : > { %v410_v35 = vpack.c.bf16 %v402_v32, %v394_v30  ;;  %v407_v36 = vpack.c.bf16 %v399_v34, %v391_v33  ;;  %v393_v37 = vld [vmem:[%s2228_s30 + $0x30] sm:$0xff] }
  0x5a   : > { %1540 = vmatpush3.bf16.msra.mxu0 %v1767_v42  ;;  %v401_v38 = vld [vmem:[%s2228_s30 + $0x70] sm:$0xff]  ;;  %s2524_s30 = sshll.u32 %s2128_s27, 4 }
  0x5b   : > { %1562 = vmatpush3.bf16.msra.mxu1 %v1768_v43  ;;  %1541 = vmatprep.subr.bf16.mxu0 %v1769_v44  ;;  %v409_v39 = vpack.c.bf16 %v401_v38, %v393_v37  ;;  %s2344_s16 = scalar_lea.vmem [#allocation4], %s2524_s30  ;;  %s2525_s26 = smov %s2524_s30 }
  0x5c   : > { %1563 = vmatprep.subr.bf16.mxu1 %v1770_v45  ;;  %s2348_s19 = scalar_lea.vmem [#allocation6], %s2525_s26 }
  0x5e   : > { %1542 = vmatpush3.bf16.msra.mxu0 %v1771_v46 }
  0x5f   : > { %1564 = vmatpush3.bf16.msra.mxu1 %v1772_v47  ;;  %1571 = vmatprep.subr.bf16.mxu0 %v1773_v60 }
  0x60   : > { %1593 = vmatprep.subr.bf16.mxu1 %v1774_v61 }
  0x61   : > { %956 = vmatmul.mubr.bf16.vlgmr.msra.gmra.mxu0 %v403_v58 }
  0x62   : > { %997 = vmatmul.mubr.bf16.vlgmr.msra.gmra.mxu1 %v405_v59  ;;  %1572 = vmatpush3.bf16.msra.mxu0 %v1775_v62 }
  0x63   : > { %1594 = vmatpush3.bf16.msra.mxu1 %v1776_v63  ;;  %1573 = vmatprep.subr.bf16.mxu0 %v1777_v0 }
  0x64   : > { %1595 = vmatprep.subr.bf16.mxu1 %v1778_v1  ;;  %1037 = vmatprep.mubr.bf16.mxu0 %v408_v31 }
  0x65   : > { %1078 = vmatprep.mubr.bf16.mxu1 %v410_v35 }
  0x66   : > { %1574 = vmatpush3.bf16.msra.mxu0 %v1779_v2 }
  0x67   : > { %1596 = vmatpush3.bf16.msra.mxu1 %v1780_v3  ;;  %1575 = vmatprep.subr.bf16.mxu0 %v1781_v4 }
  0x68   : > { %1597 = vmatprep.subr.bf16.mxu1 %v1782_v5 }
  0x6a   : > { %1576 = vmatpush3.bf16.msra.mxu0 %v1783_v6 }
  0x6b   : > { %1598 = vmatpush3.bf16.msra.mxu1 %v1784_v7  ;;  %1577 = vmatprep.subr.bf16.mxu0 %v1785_v8 }
  0x6c   : > { %1599 = vmatprep.subr.bf16.mxu1 %v1786_v9 }
  0x6e   : > { %1578 = vmatpush3.bf16.msra.mxu0 %v1787_v10 }
  0x6f   : > { %1600 = vmatpush3.bf16.msra.mxu1 %v1788_v11  ;;  %1579 = vmatprep.subr.bf16.mxu0 %v1789_v12 }
  0x70   : > { %1601 = vmatprep.subr.bf16.mxu1 %v1790_v13 }
  0x72   : > { %1580 = vmatpush3.bf16.msra.mxu0 %v1791_v14 }
  0x73   : > { %1602 = vmatpush3.bf16.msra.mxu1 %v1792_v15  ;;  %1581 = vmatprep.subr.bf16.mxu0 %v1793_v16 }
  0x74   : > { %1603 = vmatprep.subr.bf16.mxu1 %v1794_v17 }
  0x76   : > { %1582 = vmatpush3.bf16.msra.mxu0 %v1795_v18 }
  0x77   : > { %1604 = vmatpush3.bf16.msra.mxu1 %v1796_v19  ;;  %1583 = vmatprep.subr.bf16.mxu0 %v1797_v20 }
  0x78   : > { %1605 = vmatprep.subr.bf16.mxu1 %v1798_v21 }
  0x7a   : > { %1584 = vmatpush3.bf16.msra.mxu0 %v1799_v22 }
  0x7b   : > { %1606 = vmatpush3.bf16.msra.mxu1 %v1800_v23  ;;  %1585 = vmatprep.subr.bf16.mxu0 %v1801_v24 }
  0x7c   : > { %1607 = vmatprep.subr.bf16.mxu1 %v1802_v25 }
  0x7e   : > { %1586 = vmatpush3.bf16.msra.mxu0 %v1803_v26 }
  0x7f   : > { %1608 = vmatpush3.bf16.msra.mxu1 %v1804_v27 }
  0x81   : > { %1038 = vmatmul.mubr.bf16.vlgmr.msra.gmra.mxu0 %v407_v36 }
  0x82   : > { %1079 = vmatmul.mubr.bf16.vlgmr.msra.gmra.mxu1 %v409_v39 }
 0x121   : > { %v1543_v40 = vpop.f32.mrf.mxu0 }
 0x122   : > { %v1565_v41 = vpop.f32.mrf.mxu1 }
 0x123   : > { %v1544_v42 = vpop.f32.mrf.mxu0 }
 0x124   : > { %v1566_v43 = vpop.f32.mrf.mxu1  ;;  %v1545_v47 = vadd.f32 %v1544_v42, %v1543_v40 }
 0x125   : > { %v1546_v44 = vpop.f32.mrf.mxu0  ;;  %v1567_v48 = vadd.f32 %v1566_v43, %v1565_v41 }
 0x126   : > { %v1568_v45 = vpop.f32.mrf.mxu1 }
 0x127   : > { %v1547_v46 = vpop.f32.mrf.mxu0  ;;  %v999_v53 = vadd.f32 %v1567_v48, %v1545_v47 }
 0x128   : > { %v1569_v49 = vpop.f32.mrf.mxu1  ;;  %v1548_v54 = vadd.f32 %v1547_v46, %v1546_v44 }
 0x129   : > { %v1570_v55 = vadd.f32 %v1569_v49, %v1568_v45 }
 0x12b   : > { %v1002_v63 = vadd.f32 %v1570_v55, %v1548_v54 }
 0x141   : > { %v1587_v50 = vpop.f32.mrf.mxu0 }
 0x142   : > { %v1609_v51 = vpop.f32.mrf.mxu1 }
 0x143   : > { %v1588_v52 = vpop.f32.mrf.mxu0 }
 0x144   : > { %v1589_v56 = vadd.f32 %v1588_v52, %v1587_v50  ;;  %v1610_v57 = vpop.f32.mrf.mxu1 }
 0x145   : > { %v1590_v58 = vpop.f32.mrf.mxu0  ;;  %v1611_v60 = vadd.f32 %v1610_v57, %v1609_v51 }
 0x146   : > { %v1040_v59 = vadd.f32 %v1589_v56, %v999_v53  ;;  %v1612_v61 = vpop.f32.mrf.mxu1 }
 0x147   : > { %v1591_v62 = vpop.f32.mrf.mxu0 }
 0x148   : > { %v1081_v0 = vadd.f32 %v1611_v60, %v1040_v59  ;;  %v1592_v1 = vadd.f32 %v1591_v62, %v1590_v58  ;;  %v1613_v2 = vpop.f32.mrf.mxu1  ;;  %1090 = sbr.rel (%p1502_p3) target bundleno = 335 (0x14f), region = 75 }
 0x149   : > { %v1614_v4 = vadd.f32 %v1613_v2, %v1612_v61 }
 0x14a   : > { %v1043_v3 = vadd.f32 %v1592_v1, %v1002_v63 }
 0x14c   : > { %v1084_v5 = vadd.f32 %v1614_v4, %v1043_v3 }
 0x14d   : > { %1091 = vst [vmem:[#allocation2] sm:$0xff] %v1081_v0 }
 0x14e   : > { %1092 = vst [vmem:[#allocation2 + $0x8] sm:$0xff] %v1084_v5 }
 0x14f PF: > { %p1503_p4 = scmp.eq.s32.totalorder %s1939_s10, 0 }
 0x151   : > { %1096 = sbr.rel (%p1503_p4) target bundleno = 346 (0x15a), region = 79 }
 0x156   : > { %v1097_v6 = vld [vmem:[#allocation2] sm:$0xff]  ;;  %v1098_v7 = vld [vmem:[#allocation2 + $0x8] sm:$0xff] }
 0x157   : > { %v1099_v8 = vmax.f32 %v1097_v6, %v1081_v0  ;;  %v1100_v9 = vmax.f32 %v1098_v7, %v1084_v5 }
 0x159   : > { %1101 = vst [vmem:[#allocation2] sm:$0xff] %v1099_v8  ;;  %1102 = vst [vmem:[#allocation2 + $0x8] sm:$0xff] %v1100_v9 }
 0x15a PF: > { %p1504_p5 = scmp.ne.s32.totalorder %s1939_s10, 9 }
 0x15b   : > { %s2526_s2 = sld [smem:[#allocation16_spill]] (!%p1504_p5) }
 0x15c   : > { %1106 = sbr.rel (%p1504_p5) target bundleno = 869 (0x365), region = 83 }
 0x161   : > { %v1107_v10 = vld [vmem:[#allocation2] sm:$0xff]  ;;  %v1108_v12 = vld [vmem:[#allocation2 + $0x8] sm:$0xff]  ;;  %v1805_v15 = vld [vmem:[%s2503_s5 + $0x38] sm:$0xff]   ;;  %v1957_v16 = vmov 0.0   ;;  %vm1958_vm0 = vmmov 0  }
 0x162   : > { %v1505_v11 = vld [vmem:[%s2526_s2] ss:$0 sm:$0xff]  ;;  %1624 = vmatprep.subr.bf16.mxu0 %v1957_v16  ;;  %v1806_v25 = vld [vmem:[%s2503_s5 + $0x30] sm:$0xff]   ;;  %v1807_v26 = vld [vmem:[%s2503_s5 + $0x28] sm:$0xff]   ;;  %1640 = vmatprep.mubr.msk.bf16.mxu0 %vm1958_vm0, %v1957_v16 }
 0x163   : > { %v1116_v13 = vadd.f32 %v1505_v11, %v1107_v10  ;;  %v1117_v14 = vadd.f32 %v1505_v11, %v1108_v12  ;;  %1625 = vmatpush3.bf16.msra.mxu0 %v1805_v15  ;;  %v1808_v27 = vld [vmem:[%s2503_s5 + $0x20] sm:$0xff]   ;;  %v1809_v28 = vld [vmem:[%s2503_s5 + $0x18] sm:$0xff]   ;;  %v1810_v29 = vld [vmem:[%s2503_s5 + $0x10] sm:$0xff]  }
 0x164   : > { %1626 = vmatprep.subr.bf16.mxu0 %v1957_v16  ;;  %v1811_v30 = vld [vmem:[%s2503_s5 + $0x8] sm:$0xff]   ;;  %v1812_v31 = vld [vmem:[%s2503_s5] sm:$0xff]  }
 0x165   : > { %1120 = vadd.xlane.f32.xlu0 %v1116_v13  ;;  %1118 = vst [vmem:[%s2348_s19] sm:$0xff] %v1116_v13  ;;  %1119 = vst [vmem:[%s2348_s19 + $0x8] sm:$0xff] %v1117_v14  ;;  %v1506_v40 = vld [vmem:[%s2501_s3] ss:$0 sm:$0xff] }
 0x166   : > { %v1507_v44 = vld [vmem:[%s2502_s4] ss:$0 sm:$0xff] }
 0x167   : > { %1627 = vmatpush3.bf16.msra.mxu0 %v1806_v25  ;;  %v1508_v49 = vld [vmem:[%s2504_s6] ss:$0 sm:$0xff] }
 0x168   : > { %1628 = vmatprep.subr.bf16.mxu0 %v1957_v16 }
 0x169   : > { %1122 = vadd.xlane.f32.xlu0 %v1117_v14 }
 0x16b   : > { %1629 = vmatpush3.bf16.msra.mxu0 %v1807_v26 }
 0x16c   : > { %1630 = vmatprep.subr.bf16.mxu0 %v1957_v16 }
 0x16f   : > { %1631 = vmatpush3.bf16.msra.mxu0 %v1808_v27 }
 0x170   : > { %1632 = vmatprep.subr.bf16.mxu0 %v1957_v16 }
 0x173   : > { %1633 = vmatpush3.bf16.msra.mxu0 %v1809_v28 }
 0x174   : > { %1634 = vmatprep.subr.bf16.mxu0 %v1957_v16 }
 0x177   : > { %1635 = vmatpush3.bf16.msra.mxu0 %v1810_v29 }
 0x178   : > { %1636 = vmatprep.subr.bf16.mxu0 %v1957_v16 }
 0x17b   : > { %1637 = vmatpush3.bf16.msra.mxu0 %v1811_v30 }
 0x17c   : > { %1638 = vmatprep.subr.bf16.mxu0 %v1957_v16 }
 0x17f   : > { %1639 = vmatpush3.bf16.msra.mxu0 %v1812_v31 }
 0x1ee   : > { %v1121_v17 = vpop.xlane.xlu0 %1120 }
 0x1ef   : > { %v1125_v18 = vmul.f32 0.0078125, %v1121_v17 }
 0x1f1   : > { %v1127_v19 = vsub.f32 %v1116_v13, %v1125_v18 }
 0x1f2   : > { %v1123_v20 = vpop.xlane.xlu0 %1122 }
 0x1f3   : > { %v1126_v21 = vmul.f32 0.0078125, %v1123_v20  ;;  %v1129_v22 = vmul.f32 %v1127_v19, %v1127_v19 }
 0x1f5   : > { %v1128_v23 = vsub.f32 %v1117_v14, %v1126_v21  ;;  %1131 = vadd.xlane.f32.xlu1 %v1129_v22 }
 0x1f7   : > { %v1130_v24 = vmul.f32 %v1128_v23, %v1128_v23 }
 0x1f9   : > { %1133 = vadd.xlane.f32.xlu1 %v1130_v24 }
 0x27e   : > { %v1132_v32 = vpop.xlane.xlu1 %1131 }
 0x27f   : > { %v1135_v33 = vmul.f32 0.0078125, %v1132_v32 }
 0x281   : > { %v1137_v34 = vadd.f32 1e-05, %v1135_v33 }
 0x282   : > { %v1134_v35 = vpop.xlane.xlu1 %1133 }
 0x283   : > { %1813 = vrsqrt.f32 %v1137_v34  ;;  %v1136_v36 = vmul.f32 0.0078125, %v1134_v35 }
 0x285   : > { %v1138_v37 = vadd.f32 1e-05, %v1136_v36 }
 0x287   : > { %1815 = vrsqrt.f32 %v1138_v37 }
 0x290   : > { %v1814_v38 = vpop.eup %1813 }
 0x291   : > { %v1141_v39 = vmul.f32 %v1814_v38, %v1127_v19 }
 0x293   : > { %v1150_v43 = vmul.f32 %v1506_v40, %v1141_v39 }
 0x294   : > { %v1816_v41 = vpop.eup %1815 }
 0x295   : > { %v1142_v42 = vmul.f32 %v1816_v41, %v1128_v23  ;;  %v1159_v46 = vadd.f32 %v1507_v44, %v1150_v43 }
 0x297   : > { %v1151_v45 = vmul.f32 %v1506_v40, %v1142_v42 }
 0x299   : > { %v1160_v47 = vadd.f32 %v1507_v44, %v1151_v45 }
 0x29b   : > { %v1161_v48 = vpack.c.bf16 %v1160_v47, %v1159_v46 }
 0x29d   : > { %1641 = vmatmul.mubr.bf16.vlgmr.msra.gmra.mxu0 %v1161_v48 }
 0x35d   : > { %v1267_v50 = vpop.f32.mrf.mxu0 }
 0x35e   : > { %v1268_v51 = vadd.f32 %v1508_v49, %v1267_v50 }
 0x35f   : > { %v1642_v52 = vpop.f32.mrf.mxu0 }
 0x360   : > { %1274 = vst [vmem:[%s2344_s16] sm:$0xff] %v1268_v51 }
 0x361   : > { %v1270_v53 = vpop.f32.mrf.mxu0 }
 0x362   : > { %v1271_v54 = vadd.f32 %v1508_v49, %v1270_v53 }
 0x363   : > { %v1643_v55 = vpop.f32.mrf.mxu0 }
 0x364   : > { %1275 = vst [vmem:[%s2344_s16 + $0x8] sm:$0xff] %v1271_v54 }
 0x365 PF: > { %s2511_s10 = sshll.u32 %s1943_s11, 8  ;;  %s1295_s30 = sshll.u32 %s2344_s16, 4  ;;  %s2402_s30 = int_to_ptr.vmem [resolvable:$true] %s1295_s30 }
 0x366   : > { %s2399_s18 = scalar_lea.hbm %s2505_s7, %s2511_s10  ;;  %s1817_s20 = scalar_lea.vmem %s2402_s30, 256 }
 0x367   : > { %p1818_p6 = scmp.ne.s32.totalorder %s2402_s30, %s1817_s20  ;;  %s1959_s25 = smov [#allocation4]  }
 0x368   : > { %s1821_s22 = sshll.u32 %s1959_s25, 4  ;;  %s1822_s22 = int_to_ptr.vmem [resolvable:$false] %s1821_s22 }
 0x369   : > { %p1819_p8 = pnand %p1818_p6, %p2080_p7  ;;  %s1823_s24 = scalar_lea.vmem %s1822_s22, 512 }
 0x36a   : > { %p1824_p10 = scmp.lt.s32.totalorder %s2402_s30, %s1822_s22  ;;  %p1825_p11 = scmp.lt.s32.totalorder %s1823_s24, %s1817_s20 }
 0x36b   : > { %p1820_p9 = pneg %p1819_p8 }
 0x36c   : > { %p1826_p13 = por %p1825_p11, %p1824_p10 }
 0x36e   : > { %p1827_p0 = pnand %p1826_p13, %p1820_p9 }
 0x370   : > { %1830 = shalt.err (!%p1827_p0)
}
 0x371   : > { %s1831_s16 = scalar_lea.hbm %s2399_s18, 256  ;;  %s1835_s25 = scalar_lea.hbm %s2505_s7, 512 }
 0x372   : > { %p1832_p1 = scmp.ne.s32.totalorder %s2399_s18, %s1831_s16  ;;  %p1836_p4 = scmp.lt.s32.totalorder %s2399_s18, %s2505_s7 }
 0x373   : > { %p1837_p5 = scmp.lt.s32.totalorder %s1835_s25, %s1831_s16 }
 0x374   : > { %p1833_p2 = pnand %p1832_p1, %p2080_p7 }
 0x375   : > { %p1838_p6 = por %p1837_p5, %p1836_p4 }
 0x376   : > { %p1834_p3 = pneg %p1833_p2 }
 0x378   : > { %p1839_p8 = pnand %p1838_p6, %p1834_p3 }
 0x37a   : > { %1842 = shalt.err (!%p1839_p8)
}
 0x37b   : > { %s1960_s20 = smov 128   ;;  %s1961_s22 = smov 8  }
 0x37c   : > { %s2527_s10 = scalar_lea.sflag [#allocation5], %s2128_s27  ;;  %s2528_s26 = sshll.u32 %s1943_s11, 8 }
 0x37d   : > { %1645 = dma.vmem_to_hbm [thread:$0]  (%p2080_p7), %s2402_s30, 256, %s2399_s18, %s2527_s10, %s1960_s20, %s1960_s20, %s1961_s22  }
 0x37e   : > { %s2435_s21 = scalar_lea.hbm %s2506_s8, %s2528_s26  ;;  %s1311_s0 = sshll.u32 %s2348_s19, 4  ;;  %s2438_s0 = int_to_ptr.vmem [resolvable:$true] %s1311_s0 }
 0x37f   : > { %s1282_s25 = scalar_lea.sflag [#allocation7], %s2128_s27  ;;  %s1843_s1 = scalar_lea.vmem %s2438_s0, 256 }
 0x380   : > { %p1844_p9 = scmp.ne.s32.totalorder %s2438_s0, %s1843_s1  ;;  %s1962_s2 = smov [#allocation6]  }
 0x381   : > { %s1847_s18 = sshll.u32 %s1962_s2, 4  ;;  %s1848_s18 = int_to_ptr.vmem [resolvable:$false] %s1847_s18 }
 0x382   : > { %p1845_p10 = pnand %p1844_p9, %p2080_p7  ;;  %s1849_s11 = scalar_lea.vmem %s1848_s18, 512 }
 0x383   : > { %p1850_p13 = scmp.lt.s32.totalorder %s2438_s0, %s1848_s18  ;;  %p1851_p0 = scmp.lt.s32.totalorder %s1849_s11, %s1843_s1 }
 0x384   : > { %p1846_p11 = pneg %p1845_p10 }
 0x385   : > { %p1852_p1 = por %p1851_p0, %p1850_p13 }
 0x387   : > { %p1853_p2 = pnand %p1852_p1, %p1846_p11 }
 0x389   : > { %1856 = shalt.err (!%p1853_p2)
}
 0x38a   : > { %s1857_s19 = scalar_lea.hbm %s2435_s21, 256  ;;  %s1861_s2 = scalar_lea.hbm %s2506_s8, 512 }
 0x38b   : > { %p1858_p3 = scmp.ne.s32.totalorder %s2435_s21, %s1857_s19  ;;  %p1862_p6 = scmp.lt.s32.totalorder %s2435_s21, %s2506_s8 }
 0x38c   : > { %p1863_p8 = scmp.lt.s32.totalorder %s1861_s2, %s1857_s19 }
 0x38d   : > { %p1859_p4 = pnand %p1858_p3, %p2080_p7 }
 0x38e   : > { %p1864_p9 = por %p1863_p8, %p1862_p6 }
 0x38f   : > { %p1860_p5 = pneg %p1859_p4 }
 0x391   : > { %p1865_p10 = pnand %p1864_p9, %p1860_p5 }
 0x393   : > { %1868 = shalt.err (!%p1865_p10)
}
 0x394   : > { %1646 = dma.vmem_to_hbm [thread:$0]  (%p2080_p7), %s2438_s0, 256, %s2435_s21, %s1282_s25, %s1960_s20, %s1960_s20, %s1961_s22  }
 0x395 PF: > { %s2529_s1 = sld [smem:[#allocation10_spill]]  ;;  %p1656_p11 = scmp.ge.s32.totalorder %s1955_s14, 2 }
 0x397   : > { %p1650_p13 = pnand %p1656_p11, %p2088_p12 }
 0x399   : > { %p1651_p0 = pneg %p1650_p13 }
 0x39b   : > { %s1326_s16 = sand.u32 1, %s2529_s1  }
 0x39c   : > { %s1327_s18 = scalar_lea.sflag [#allocation5], %s1326_s16 }
 0x39d   : > { %1910 = dma.done.wait (%p1651_p0), %s1327_s18, 256  }
 0x39e   : > { %1912 = vsyncadd (%p1651_p0), %s1327_s18, 4294967040  ;;  %s1336_s11 = scalar_lea.sflag [#allocation7], %s1326_s16 }
 0x39f   : > { %1914 = dma.done.wait (%p1651_p0), %s1336_s11, 256  }
 0x3a0   : > { %1916 = vsyncadd (%p1651_p0), %s1336_s11, 4294967040  ;;  %s25_s14 = sadd.s32 1, %s1955_s14   ;;  %s2531_s23 = sld [smem:[#allocation11_spill]] }
 0x3a1   : > { %p22_p1 = scmp.ge.s32.totalorder %s25_s14, 22   ;;  %s2532_s20 = sld [smem:[#allocation12_spill]] }
 0x3a2   : > { %s2533_s27 = smov %s1923_s28  ;;  %s2534_s28 = smov %s1927_s29 }
 0x3a3   : > { %s2535_s29 = smov %s2093_s17  ;;  %s2536_s30 = smov %s1935_s9 }
 0x3a4   : > { %s2537_s9 = smov %s2096_s15  ;;  %s2538_s10 = smov %s1947_s12 }
 0x3a5   : > { %s2539_s11 = smov %s1951_s13  ;;  %24 = sbr.rel (!%p22_p1) target bundleno = 12 (0xc), region = 140 }
 0x3a6   : > { %s2540_s12 = smov %s2531_s23 }
 0x3a7   : > { %s2541_s13 = smov %s2532_s20 }
 0x3aa   :  { %1341 = vsyncpa [#allocation5], 1 }
 0x3ab   :  { %1343 = vsyncpa [#allocation5 + $0x1], 1 }
 0x3ac   :  { %1344 = vsyncpa [#allocation7], 1 }
 0x3ad   :  { %1346 = vsyncpa [#allocation7 + $0x1], 1 }

</bundles_post_ra>
